<compile_context>
chip_gen: v7x
topology: tpu7x:2x2x1
jax: 0.10.0
libtpu: 0.0.40
codegen_flags: <defaults>
</compile_context>

<pallas_src>
import functools

import jax
import jax.numpy as jnp
from jax.experimental import pallas as pl
from jax.experimental.pallas import tpu as pltpu


# -----------------------------------------------------------------------------
# Pallas kernel 1: batched masked LSTM recurrence over independent streams.
# Grid = (streams, time). gates_x (= x @ W_ih + b) is precomputed outside; only
# h @ W_hh + gate math + validity select run per step. h/c live in VMEM scratch;
# the last valid hidden state per stream is emitted at t == T-1.
# -----------------------------------------------------------------------------
def _lstm_stream_kernel(gx_ref, lo_ref, hi_ref, whh_ref, h_out_ref,
                        h_sc, c_sc, *, hidden):
    t = pl.program_id(1)

    @pl.when(t == 0)
    def _():
        h_sc[...] = jnp.zeros_like(h_sc)
        c_sc[...] = jnp.zeros_like(c_sc)

    h = h_sc[...]                                    # [Bp, H]
    c = c_sc[...]                                    # [Bp, H]

    # Pre-activations for this step + recurrent contribution (PyTorch order i,f,g,o).
    gates = gx_ref[...] + jnp.dot(h, whh_ref[...],
                                  preferred_element_type=jnp.float32)   # [Bp, 4H]

    i_g = jax.nn.sigmoid(gates[:, 0 * hidden:1 * hidden])
    f_g = jax.nn.sigmoid(gates[:, 1 * hidden:2 * hidden])
    g_g = jnp.tanh(gates[:, 2 * hidden:3 * hidden])
    o_g = jax.nn.sigmoid(gates[:, 3 * hidden:4 * hidden])

    c_new = f_g * c + i_g * g_g
    h_new = o_g * jnp.tanh(c_new)

    # Step t is valid iff lo <= t < hi (per batch row); otherwise freeze state.
    tf = t.astype(jnp.float32)
    valid = jnp.logical_and(tf >= lo_ref[...], tf < hi_ref[...])   # [Bp, 1]
    h_sc[...] = jnp.where(valid, h_new, h)
    c_sc[...] = jnp.where(valid, c_new, c)

    @pl.when(t == pl.num_programs(1) - 1)
    def _():
        h_out_ref[...] = h_sc[...]


def lstm_streams(gx, lo, hi, whh):
    """Run S independent masked LSTM streams in one pallas_call.

    gx : [S, T, Bp, 4H] f32  precomputed x@W_ih + bias (time-major per stream)
    lo, hi : [S, Bp, 1] f32  step t valid iff lo <= t < hi
    whh: [S, H, 4H] f32      recurrent weights per stream
    returns [S, Bp, H] f32   last valid hidden state per stream
    """
    S, T, Bp, G = gx.shape
    H = whh.shape[1]
    assert G == 4 * H
    kernel = functools.partial(_lstm_stream_kernel, hidden=H)
    return pl.pallas_call(
        kernel,
        out_shape=jax.ShapeDtypeStruct((S, Bp, H), jnp.float32),
        grid_spec=pltpu.PrefetchScalarGridSpec(
            num_scalar_prefetch=0,
            grid=(S, T),
            in_specs=[
                # leading stream/time dims squeezed -> 2-D refs inside the kernel
                pl.BlockSpec((None, None, Bp, G), lambda s, t: (s, t, 0, 0)),
                pl.BlockSpec((None, Bp, 1), lambda s, t: (s, 0, 0)),
                pl.BlockSpec((None, Bp, 1), lambda s, t: (s, 0, 0)),
                pl.BlockSpec((None, H, G), lambda s, t: (s, 0, 0)),
            ],
            out_specs=pl.BlockSpec((None, Bp, H), lambda s, t: (s, 0, 0)),
            scratch_shapes=[pltpu.VMEM((Bp, H), jnp.float32),
                            pltpu.VMEM((Bp, H), jnp.float32)],
        ),
        compiler_params=pltpu.CompilerParams(
            dimension_semantics=("parallel", "arbitrary"),
            vmem_limit_bytes=32 * 1024 * 1024),
    )(gx, lo, hi, whh)


# -----------------------------------------------------------------------------
# Pallas kernel 2: fused projection MLP + cosine similarities + per-row hinge.
# The three branch matmuls are concatenated into one MXU pass. The final mean
# over B rows is done outside (trivial) to keep all kernel stores full-block.
# -----------------------------------------------------------------------------
def _fuse_loss_kernel(feat_ref, anc_ref, neg_ref, wcat_ref, bcat_ref,
                      wf_ref, bf_ref, loss_ref, *, margin):
    pre = (jnp.dot(feat_ref[...], wcat_ref[...],
                   preferred_element_type=jnp.float32) + bcat_ref[...])
    code = (jnp.dot(jnp.tanh(pre), wf_ref[...],
                    preferred_element_type=jnp.float32) + bf_ref[...])      # [B, H]

    def cos_sim(a, b):
        eps = 1e-8
        ab = jnp.sum(a * b, axis=-1, keepdims=True)
        aa = jnp.sum(a * a, axis=-1, keepdims=True)
        bb = jnp.sum(b * b, axis=-1, keepdims=True)
        return ab * jax.lax.rsqrt(jnp.maximum(aa * bb, eps * eps))          # [B, 1]

    a_sim = cos_sim(code, anc_ref[...])                                     # [B, 1]
    n_sim = cos_sim(code, neg_ref[...])                                     # [B, 1]
    loss_ref[...] = jnp.maximum(margin - a_sim + n_sim, 1e-6)               # [B, 1]


def fuse_and_loss(feat, anc, neg, w_cat, b_cat, wf, bf, margin):
    B = feat.shape[0]
    kernel = functools.partial(_fuse_loss_kernel, margin=float(margin))
    vmem = pltpu.MemorySpace.VMEM
    per_row = pl.pallas_call(
        kernel,
        out_shape=jax.ShapeDtypeStruct((B, 1), jnp.float32),
        in_specs=[pl.BlockSpec(memory_space=vmem)] * 7,
        out_specs=pl.BlockSpec(memory_space=vmem),
    )(feat, anc, neg, w_cat, b_cat, wf, bf)
    return jnp.mean(per_row)


# -----------------------------------------------------------------------------
# JAX glue: embedding gathers, gate pre-computation, stream packing.
# -----------------------------------------------------------------------------
def _round_up(n, m):
    return ((n + m - 1) // m) * m


def _pad_time(ids, t_max):
    return jnp.pad(ids, ((0, 0), (0, t_max - ids.shape[1])))


def _embed(table, ids):
    # TODO(synk): embedding gather stays in XLA glue; no clean TPU-Pallas gather.
    return jnp.take(table, ids, axis=0).astype(jnp.float32)       # [B, T, E]


def _bi_stream_inputs(ids, lens, emb_table, p_fwd, p_bwd, b_pad):
    """Forward + (full-time-reversed) backward streams for one bi-LSTM encoder."""
    B, T = ids.shape
    emb = _embed(emb_table, ids)                                   # [B, T, E]
    emb = jnp.pad(emb, ((0, b_pad - B), (0, 0), (0, 0)))           # [Bp, T, E]
    lens_f = jnp.pad(lens, (0, b_pad - B)).astype(jnp.float32)[:, None]  # [Bp, 1]

    # Hoisted input projection (one big matmul per direction), time-major output.
    gx_f = jnp.einsum('bte,ef->tbf', emb, p_fwd['w_ih']) + p_fwd['b'][0]
    gx_b = jnp.einsum('bte,ef->tbf', emb[:, ::-1, :], p_bwd['w_ih']) + p_bwd['b'][0]

    # fwd valid window: [0, len) ; bwd (full-reversed sequence): [T-len, T)
    lo = jnp.stack([jnp.zeros_like(lens_f), T - lens_f], axis=0)   # [2, Bp, 1]
    hi = jnp.stack([lens_f, jnp.full_like(lens_f, float(T))], axis=0)
    gx = jnp.stack([gx_f, gx_b], axis=0)                           # [2, T, Bp, 4L]
    return gx, lo, hi


def _desc_stream_inputs(anchor, neg, anchor_len, neg_len, emb_table, p, b_pad2):
    """Anchor + negative descriptions share weights -> one stream, batch-concat."""
    T = max(anchor.shape[1], neg.shape[1])
    ids = jnp.concatenate([_pad_time(anchor, T), _pad_time(neg, T)], axis=0)
    lens = jnp.concatenate([anchor_len, neg_len], axis=0)
    B2 = ids.shape[0]
    emb = _embed(emb_table, ids)
    emb = jnp.pad(emb, ((0, b_pad2 - B2), (0, 0), (0, 0)))
    lens_f = jnp.pad(lens, (0, b_pad2 - B2)).astype(jnp.float32)[:, None]

    gx = jnp.einsum('bte,ef->tbf', emb, p['w_ih']) + p['b'][0]     # [T, Bp2, 4H]
    lo = jnp.zeros_like(lens_f)
    hi = lens_f
    return gx[None], lo[None], hi[None]


def joint_embeder_forward(params, config, name, name_len, tokens, tok_len,
                          api, api_len, desc_anchor, desc_anchor_len,
                          desc_neg, desc_neg_len):
    B = name.shape[0]
    b_pad = _round_up(max(B, 8), 8)          # fill vreg sublanes

    # ---- code side: 4 LSTM streams (name f/b, api f/b) in ONE pallas_call ----
    T_code = max(name.shape[1], api.shape[1])
    gx_n, lo_n, hi_n = _bi_stream_inputs(_pad_time(name, T_code), name_len,
                                         params['name_emb'],
                                         params['name_lstm_f'],
                                         params['name_lstm_b'], b_pad)
    gx_a, lo_a, hi_a = _bi_stream_inputs(_pad_time(api, T_code), api_len,
                                         params['api_emb'],
                                         params['api_lstm_f'],
                                         params['api_lstm_b'], b_pad)
    gx = jnp.concatenate([gx_n, gx_a], axis=0)                     # [4, T, Bp, 4L]
    lo = jnp.concatenate([lo_n, lo_a], axis=0)
    hi = jnp.concatenate([hi_n, hi_a], axis=0)
    whh = jnp.stack([params['name_lstm_f']['w_hh'], params['name_lstm_b']['w_hh'],
                     params['api_lstm_f']['w_hh'], params['api_lstm_b']['w_hh']],
                    axis=0)                                        # [4, L, 4L]
    h_code = lstm_streams(gx, lo, hi, whh)                         # [4, Bp, L]
    name_repr = jnp.concatenate([h_code[0, :B], h_code[1, :B]], axis=-1)
    api_repr = jnp.concatenate([h_code[2, :B], h_code[3, :B]], axis=-1)

    # ---- BOW encoder: embed + max-pool over time (tiny; stays in JAX) ----
    tok_repr = jnp.max(_embed(params['tok_emb'], tokens), axis=1)  # [B, E]

    # ---- desc side: anchor + neg as one batched stream (shared weights) ----
    b_pad2 = _round_up(max(2 * B, 8), 8)
    gx_d, lo_d, hi_d = _desc_stream_inputs(desc_anchor, desc_neg,
                                           desc_anchor_len, desc_neg_len,
                                           params['desc_emb'],
                                           params['desc_lstm'], b_pad2)
    h_desc = lstm_streams(gx_d, lo_d, hi_d,
                          params['desc_lstm']['w_hh'][None])       # [1, Bp2, H]
    anc_repr = h_desc[0, :B]
    neg_repr = h_desc[0, B:2 * B]

    # ---- fuse + cosine + ranking loss in one kernel (mean outside) ----
    feat = jnp.concatenate([name_repr, tok_repr, api_repr], axis=-1)   # [B, 2L+E+2L]
    w_cat = jnp.concatenate([params['w_name_w'], params['w_tok_w'],
                             params['w_api_w']], axis=0)               # [2L+E+2L, H]
    b_cat = params['w_name_b'] + params['w_tok_b'] + params['w_api_b']
    loss = fuse_and_loss(feat, anc_repr, neg_repr, w_cat, b_cat,
                         params['fuse3_w'], params['fuse3_b'], config['margin'])
    return loss


# -----------------------------------------------------------------------------
# Pure-JAX reference (independent formulation: scan + reverse-within-length).
# -----------------------------------------------------------------------------
def _time_major(x_bte):
    return jnp.transpose(x_bte, (1, 0, 2))


def _length_mask_tm(lens, T):
    m = (jnp.arange(T)[:, None] < lens[None, :]).astype(jnp.float32)
    return m[:, :, None]


def _reverse_within_length(ids, lens):
    B, T = ids.shape
    t = jnp.arange(T)[None, :]
    rev = jnp.where(t < lens[:, None], lens[:, None] - 1 - t, t)
    return jnp.take_along_axis(ids, rev, axis=1)


def _ref_lstm(x_tm, mask_tm, w_ih, w_hh, b):
    H = w_hh.shape[0]

    def step(carry, xm):
        h, c = carry
        x, m = xm
        g = x @ w_ih + h @ w_hh + b[0]
        i = jax.nn.sigmoid(g[:, 0 * H:1 * H])
        f = jax.nn.sigmoid(g[:, 1 * H:2 * H])
        gg = jnp.tanh(g[:, 2 * H:3 * H])
        o = jax.nn.sigmoid(g[:, 3 * H:4 * H])
        c_new = f * c + i * gg
        h_new = o * jnp.tanh(c_new)
        h = m * h_new + (1.0 - m) * h
        c = m * c_new + (1.0 - m) * c
        return (h, c), None

    Bv = x_tm.shape[1]
    init = (jnp.zeros((Bv, H), jnp.float32), jnp.zeros((Bv, H), jnp.float32))
    (h, _), _ = jax.lax.scan(step, init, (x_tm, mask_tm))
    return h


def _ref_forward(params, config, name, name_len, tokens, tok_len, api, api_len,
                 desc_anchor, desc_anchor_len, desc_neg, desc_neg_len):
    def seq_bi(ids, lens, emb, pf, pb):
        T = ids.shape[1]
        mask = _length_mask_tm(lens, T)
        hf = _ref_lstm(_time_major(_embed(emb, ids)), mask,
                       pf['w_ih'], pf['w_hh'], pf['b'])
        hb = _ref_lstm(_time_major(_embed(emb, _reverse_within_length(ids, lens))),
                       mask, pb['w_ih'], pb['w_hh'], pb['b'])
        return jnp.concatenate([hf, hb], axis=-1)

    name_repr = seq_bi(name, name_len, params['name_emb'],
                       params['name_lstm_f'], params['name_lstm_b'])
    api_repr = seq_bi(api, api_len, params['api_emb'],
                      params['api_lstm_f'], params['api_lstm_b'])
    tok_repr = jnp.max(_embed(params['tok_emb'], tokens), axis=1)
    anc = _ref_lstm(_time_major(_embed(params['desc_emb'], desc_anchor)),
                    _length_mask_tm(desc_anchor_len, desc_anchor.shape[1]),
                    params['desc_lstm']['w_ih'], params['desc_lstm']['w_hh'],
                    params['desc_lstm']['b'])
    neg = _ref_lstm(_time_major(_embed(params['desc_emb'], desc_neg)),
                    _length_mask_tm(desc_neg_len, desc_neg.shape[1]),
                    params['desc_lstm']['w_ih'], params['desc_lstm']['w_hh'],
                    params['desc_lstm']['b'])

    pre = (name_repr @ params['w_name_w'] + params['w_name_b'][0]
           + tok_repr @ params['w_tok_w'] + params['w_tok_b'][0]
           + api_repr @ params['w_api_w'] + params['w_api_b'][0])
    code = jnp.tanh(pre) @ params['fuse3_w'] + params['fuse3_b'][0]

    def cos(a, b):
        eps = 1e-8
        ab = jnp.sum(a * b, axis=-1)
        denom = jnp.sqrt(jnp.maximum(jnp.sum(a * a, -1) * jnp.sum(b * b, -1),
                                     eps * eps))
        return ab / denom

    a_sim = cos(code, anc)
    n_sim = cos(code, neg)
    return jnp.mean(jnp.maximum(config['margin'] - a_sim + n_sim, 1e-6))


# -----------------------------------------------------------------------------
# Deterministic parameter init (shapes from the module's __init__).
# -----------------------------------------------------------------------------
def init_params(key, config):
    V = config['n_words']
    E = config['emb_size']
    L = config['lstm_dims']
    H = config['n_hidden']
    ks = iter(jax.random.split(key, 40))

    def unif(k, shape, a=0.1):
        return jax.random.uniform(k, shape, jnp.float32, -a, a)

    def emb_table(k):
        t = unif(k, (V, E))
        return t.at[0].set(0.0)                    # padding_idx=0

    def lstm(kin, khid, hidden):
        # single bias = b_ih + b_hh (zero at init)
        return {'w_ih': unif(kin, (E, 4 * hidden)),
                'w_hh': unif(khid, (hidden, 4 * hidden)),
                'b': jnp.zeros((1, 4 * hidden), jnp.float32)}

    params = {
        'name_emb': emb_table(next(ks)),
        'tok_emb': emb_table(next(ks)),
        'api_emb': emb_table(next(ks)),
        'desc_emb': emb_table(next(ks)),
        'name_lstm_f': lstm(next(ks), next(ks), L),
        'name_lstm_b': lstm(next(ks), next(ks), L),
        'api_lstm_f': lstm(next(ks), next(ks), L),
        'api_lstm_b': lstm(next(ks), next(ks), L),
        'desc_lstm': lstm(next(ks), next(ks), H),
        # Linear weights stored as [in, out]; biases as [1, out].
        'w_name_w': unif(next(ks), (2 * L, H)),
        'w_name_b': jnp.zeros((1, H), jnp.float32),
        'w_tok_w': unif(next(ks), (E, H)),
        'w_tok_b': jnp.zeros((1, H), jnp.float32),
        'w_api_w': unif(next(ks), (2 * L, H)),
        'w_api_b': jnp.zeros((1, H), jnp.float32),
        'fuse3_w': unif(next(ks), (H, H)),
        'fuse3_b': jnp.zeros((1, H), jnp.float32),
    }
    return params


if __name__ == "__main__":
    config = dict(n_words=50, emb_size=32, lstm_dims=16, n_hidden=32,
                  margin=0.6, dropout=0.0, sim_measure='cos')
    B, T = 2, 8

    key = jax.random.PRNGKey(0)
    k_param, k_ids, k_len = jax.random.split(key, 3)
    params = init_params(k_param, config)

    ik = jax.random.split(k_ids, 5)
    lk = jax.random.split(k_len, 5)

    def mk(kid, klen):
        ids = jax.random.randint(kid, (B, T), 1, config['n_words'], jnp.int32)
        lens = jax.random.randint(klen, (B,), 3, T + 1, jnp.int32)
        return ids, lens

    name, name_len = mk(ik[0], lk[0])
    tokens, tok_len = mk(ik[1], lk[1])
    api, api_len = mk(ik[2], lk[2])
    desc_anchor, desc_anchor_len = mk(ik[3], lk[3])
    desc_neg, desc_neg_len = mk(ik[4], lk[4])

    args = (name, name_len, tokens, tok_len, api, api_len,
            desc_anchor, desc_anchor_len, desc_neg, desc_neg_len)

    loss = jax.jit(functools.partial(joint_embeder_forward, params, config))(*args)
    loss = jax.block_until_ready(loss)

    ref = _ref_forward(params, config, *args)
    assert jnp.isfinite(loss), "loss is not finite"
    assert jnp.allclose(loss, ref, rtol=1e-3, atol=1e-3), (loss, ref)

    print("KERNEL_OK")
</pallas_src>

<mosaic_0001>
module attributes {stable_mosaic.version = 11 : i64} {
  func.func @_lstm_stream_kernel(%arg0: i32, %arg1: i32, %arg2: memref<1x1x8x64xf32, #tpu.memory_space<vmem>>, %arg3: memref<1x8x1xf32, #tpu.memory_space<vmem>>, %arg4: memref<1x8x1xf32, #tpu.memory_space<vmem>>, %arg5: memref<1x16x64xf32, #tpu.memory_space<vmem>>, %arg6: memref<1x8x16xf32, #tpu.memory_space<vmem>>, %arg7: memref<8x16xf32, #tpu.memory_space<vmem>>, %arg8: memref<8x16xf32, #tpu.memory_space<vmem>>) attributes {dimension_semantics = [#tpu.dimension_semantics<parallel>, #tpu.dimension_semantics<arbitrary>], iteration_bounds = array<i64: 4, 8>, scalar_prefetch = 0 : i64, scratch_operands = 2 : i64, tpu.core_type = #tpu.core_type<tc>, window_params = [{transform_indices = @transform_0, window_bounds = array<i64: 1, 1, 8, 64>}, {transform_indices = @transform_1, window_bounds = array<i64: 1, 8, 1>}, {transform_indices = @transform_2, window_bounds = array<i64: 1, 8, 1>}, {transform_indices = @transform_3, window_bounds = array<i64: 1, 16, 64>}, {transform_indices = @transform_4, window_bounds = array<i64: 1, 8, 16>}]} {
    %c0_i32 = arith.constant 0 : i32
    %0 = arith.cmpi eq, %arg1, %c0_i32 : i32
    %1 = arith.extui %0 : i1 to i32
    %c0_i32_0 = arith.constant 0 : i32
    %2 = arith.cmpi ne, %1, %c0_i32_0 : i32
    scf.if %2 {
      %cst_25 = arith.constant 0.000000e+00 : f32
      %57 = vector.broadcast %cst_25 : f32 to vector<8x16xf32>
      %c0_26 = arith.constant 0 : index
      %c0_27 = arith.constant 0 : index
      %58 = vector.load %arg7[%c0_26, %c0_27] : memref<8x16xf32, #tpu.memory_space<vmem>>, vector<8x16xf32>
      tpu.vector_store %arg7[%c0_26, %c0_27], %57 {strides = array<i32>} : memref<8x16xf32, #tpu.memory_space<vmem>>, vector<8x16xf32>,
      %cst_28 = arith.constant 0.000000e+00 : f32
      %59 = vector.broadcast %cst_28 : f32 to vector<8x16xf32>
      %c0_29 = arith.constant 0 : index
      %c0_30 = arith.constant 0 : index
      %60 = vector.load %arg8[%c0_29, %c0_30] : memref<8x16xf32, #tpu.memory_space<vmem>>, vector<8x16xf32>
      tpu.vector_store %arg8[%c0_29, %c0_30], %59 {strides = array<i32>} : memref<8x16xf32, #tpu.memory_space<vmem>>, vector<8x16xf32>,
    } else {
    }
    %c0 = arith.constant 0 : index
    %c0_1 = arith.constant 0 : index
    %3 = vector.load %arg7[%c0, %c0_1] : memref<8x16xf32, #tpu.memory_space<vmem>>, vector<8x16xf32>
    %c0_2 = arith.constant 0 : index
    %c0_3 = arith.constant 0 : index
    %4 = vector.load %arg8[%c0_2, %c0_3] : memref<8x16xf32, #tpu.memory_space<vmem>>, vector<8x16xf32>
    %c0_4 = arith.constant 0 : index
    %c0_5 = arith.constant 0 : index
    %c0_6 = arith.constant 0 : index
    %c0_7 = arith.constant 0 : index
    %5 = vector.load %arg2[%c0_4, %c0_5, %c0_6, %c0_7] : memref<1x1x8x64xf32, #tpu.memory_space<vmem>>, vector<1x1x8x64xf32>
    %6 = vector.shape_cast %5 : vector<1x1x8x64xf32> to vector<8x64xf32>
    %c0_8 = arith.constant 0 : index
    %c0_9 = arith.constant 0 : index
    %c0_10 = arith.constant 0 : index
    %7 = vector.load %arg5[%c0_8, %c0_9, %c0_10] : memref<1x16x64xf32, #tpu.memory_space<vmem>>, vector<1x16x64xf32>
    %8 = vector.shape_cast %7 : vector<1x16x64xf32> to vector<16x64xf32>
    %cst = arith.constant dense<0.000000e+00> : vector<8x64xf32>
    %9 = tpu.matmul %3, %8, %cst {dimension_numbers = #tpu.dot_dimension_numbers<[1], [0], [0], [1], [0, 0, 1, 1], [], []>} : vector<8x16xf32>, vector<16x64xf32>, vector<8x64xf32> -> vector<8x64xf32>
    %10 = arith.addf %6, %9 : vector<8x64xf32>
    %11 = vector.extract_strided_slice %10 {offsets = [0, 0], sizes = [8, 16], strides = [1, 1]} : vector<8x64xf32> to vector<8x16xf32>
    %12 = arith.negf %11 : vector<8x16xf32>
    %13 = math.exp %12 : vector<8x16xf32>
    %cst_11 = arith.constant 1.000000e+00 : f32
    %14 = vector.broadcast %cst_11 : f32 to vector<8x16xf32>
    %15 = arith.addf %14, %13 : vector<8x16xf32>
    %16 = arith.divf %14, %15 : vector<8x16xf32>
    %17 = vector.extract_strided_slice %10 {offsets = [0, 16], sizes = [8, 16], strides = [1, 1]} : vector<8x64xf32> to vector<8x16xf32>
    %18 = arith.negf %17 : vector<8x16xf32>
    %19 = math.exp %18 : vector<8x16xf32>
    %cst_12 = arith.constant 1.000000e+00 : f32
    %20 = vector.broadcast %cst_12 : f32 to vector<8x16xf32>
    %21 = arith.addf %20, %19 : vector<8x16xf32>
    %22 = arith.divf %20, %21 : vector<8x16xf32>
    %23 = vector.extract_strided_slice %10 {offsets = [0, 32], sizes = [8, 16], strides = [1, 1]} : vector<8x64xf32> to vector<8x16xf32>
    %24 = math.tanh %23 : vector<8x16xf32>
    %25 = vector.extract_strided_slice %10 {offsets = [0, 48], sizes = [8, 16], strides = [1, 1]} : vector<8x64xf32> to vector<8x16xf32>
    %26 = arith.negf %25 : vector<8x16xf32>
    %27 = math.exp %26 : vector<8x16xf32>
    %cst_13 = arith.constant 1.000000e+00 : f32
    %28 = vector.broadcast %cst_13 : f32 to vector<8x16xf32>
    %29 = arith.addf %28, %27 : vector<8x16xf32>
    %30 = arith.divf %28, %29 : vector<8x16xf32>
    %31 = arith.mulf %22, %4 : vector<8x16xf32>
    %32 = arith.mulf %16, %24 : vector<8x16xf32>
    %33 = arith.addf %31, %32 : vector<8x16xf32>
    %34 = math.tanh %33 : vector<8x16xf32>
    %35 = arith.mulf %30, %34 : vector<8x16xf32>
    %36 = arith.sitofp %arg1 : i32 to f32
    %c0_14 = arith.constant 0 : index
    %c0_15 = arith.constant 0 : index
    %c0_16 = arith.constant 0 : index
    %37 = vector.load %arg3[%c0_14, %c0_15, %c0_16] : memref<1x8x1xf32, #tpu.memory_space<vmem>>, vector<1x8x1xf32>
    %38 = vector.shape_cast %37 : vector<1x8x1xf32> to vector<8x1xf32>
    %39 = vector.broadcast %36 : f32 to vector<8x1xf32>
    %40 = arith.cmpf oge, %39, %38 : vector<8x1xf32>
    %c0_17 = arith.constant 0 : index
    %c0_18 = arith.constant 0 : index
    %c0_19 = arith.constant 0 : index
    %41 = vector.load %arg4[%c0_17, %c0_18, %c0_19] : memref<1x8x1xf32, #tpu.memory_space<vmem>>, vector<1x8x1xf32>
    %42 = vector.shape_cast %41 : vector<1x8x1xf32> to vector<8x1xf32>
    %43 = vector.broadcast %36 : f32 to vector<8x1xf32>
    %44 = arith.cmpf olt, %43, %42 : vector<8x1xf32>
    %45 = arith.andi %40, %44 : vector<8x1xi1>
    %46 = vector.shape_cast %45 : vector<8x1xi1> to vector<8x1xi1>
    %47 = vector.broadcast %46 : vector<8x1xi1> to vector<8x16xi1>
    %48 = arith.select %47, %35, %3 : vector<8x16xi1>, vector<8x16xf32>
    %c0_20 = arith.constant 0 : index
    %c0_21 = arith.constant 0 : index
    %49 = vector.load %arg7[%c0_20, %c0_21] : memref<8x16xf32, #tpu.memory_space<vmem>>, vector<8x16xf32>
    tpu.vector_store %arg7[%c0_20, %c0_21], %48 {strides = array<i32>} : memref<8x16xf32, #tpu.memory_space<vmem>>, vector<8x16xf32>,
    %50 = vector.shape_cast %45 : vector<8x1xi1> to vector<8x1xi1>
    %51 = vector.broadcast %50 : vector<8x1xi1> to vector<8x16xi1>
    %52 = arith.select %51, %33, %4 : vector<8x16xi1>, vector<8x16xf32>
    %c0_22 = arith.constant 0 : index
    %c0_23 = arith.constant 0 : index
    %53 = vector.load %arg8[%c0_22, %c0_23] : memref<8x16xf32, #tpu.memory_space<vmem>>, vector<8x16xf32>
    tpu.vector_store %arg8[%c0_22, %c0_23], %52 {strides = array<i32>} : memref<8x16xf32, #tpu.memory_space<vmem>>, vector<8x16xf32>,
    %c7_i32 = arith.constant 7 : i32
    %54 = arith.cmpi eq, %arg1, %c7_i32 : i32
    %55 = arith.extui %54 : i1 to i32
    %c0_i32_24 = arith.constant 0 : i32
    %56 = arith.cmpi ne, %55, %c0_i32_24 : i32
    scf.if %56 {
      %c0_25 = arith.constant 0 : index
      %c0_26 = arith.constant 0 : index
      %57 = vector.load %arg7[%c0_25, %c0_26] : memref<8x16xf32, #tpu.memory_space<vmem>>, vector<8x16xf32>
      %c0_27 = arith.constant 0 : index
      %c0_28 = arith.constant 0 : index
      %c0_29 = arith.constant 0 : index
      %58 = vector.load %arg6[%c0_27, %c0_28, %c0_29] : memref<1x8x16xf32, #tpu.memory_space<vmem>>, vector<1x8x16xf32>
      %59 = vector.shape_cast %58 : vector<1x8x16xf32> to vector<8x16xf32>
      %60 = vector.shape_cast %57 : vector<8x16xf32> to vector<1x8x16xf32>
      tpu.vector_store %arg6[%c0_27, %c0_28, %c0_29], %60 {strides = array<i32>} : memref<1x8x16xf32, #tpu.memory_space<vmem>>, vector<1x8x16xf32>,
    } else {
    }
    return
  }
  func.func @transform_0(%arg0: i32, %arg1: i32) -> (i32, i32, i32, i32) {
    %c0_i32 = arith.constant 0 : i32
    %c0_i32_0 = arith.constant 0 : i32
    %c0_i32_1 = arith.constant 0 : i32
    return %arg0, %arg1, %c0_i32, %c0_i32_0 : i32, i32, i32, i32
  }
  func.func @transform_1(%arg0: i32, %arg1: i32) -> (i32, i32, i32) {
    %c0_i32 = arith.constant 0 : i32
    %c0_i32_0 = arith.constant 0 : i32
    %c0_i32_1 = arith.constant 0 : i32
    return %arg0, %c0_i32, %c0_i32_0 : i32, i32, i32
  }
  func.func @transform_2(%arg0: i32, %arg1: i32) -> (i32, i32, i32) {
    %c0_i32 = arith.constant 0 : i32
    %c0_i32_0 = arith.constant 0 : i32
    %c0_i32_1 = arith.constant 0 : i32
    return %arg0, %c0_i32, %c0_i32_0 : i32, i32, i32
  }
  func.func @transform_3(%arg0: i32, %arg1: i32) -> (i32, i32, i32) {
    %c0_i32 = arith.constant 0 : i32
    %c0_i32_0 = arith.constant 0 : i32
    %c0_i32_1 = arith.constant 0 : i32
    return %arg0, %c0_i32, %c0_i32_0 : i32, i32, i32
  }
  func.func @transform_4(%arg0: i32, %arg1: i32) -> (i32, i32, i32) {
    %c0_i32 = arith.constant 0 : i32
    %c0_i32_0 = arith.constant 0 : i32
    %c0_i32_1 = arith.constant 0 : i32
    return %arg0, %c0_i32, %c0_i32_0 : i32, i32, i32
  }
}

module attributes {stable_mosaic.version = 11 : i64} {
  func.func @_lstm_stream_kernel(%arg0: i32, %arg1: i32, %arg2: memref<1x1x8x128xf32, #tpu.memory_space<vmem>>, %arg3: memref<1x8x1xf32, #tpu.memory_space<vmem>>, %arg4: memref<1x8x1xf32, #tpu.memory_space<vmem>>, %arg5: memref<1x32x128xf32, #tpu.memory_space<vmem>>, %arg6: memref<1x8x32xf32, #tpu.memory_space<vmem>>, %arg7: memref<8x32xf32, #tpu.memory_space<vmem>>, %arg8: memref<8x32xf32, #tpu.memory_space<vmem>>) attributes {dimension_semantics = [#tpu.dimension_semantics<parallel>, #tpu.dimension_semantics<arbitrary>], iteration_bounds = array<i64: 1, 8>, scalar_prefetch = 0 : i64, scratch_operands = 2 : i64, tpu.core_type = #tpu.core_type<tc>, window_params = [{transform_indices = @transform_0, window_bounds = array<i64: 1, 1, 8, 128>}, {transform_indices = @transform_1, window_bounds = array<i64: 1, 8, 1>}, {transform_indices = @transform_2, window_bounds = array<i64: 1, 8, 1>}, {transform_indices = @transform_3, window_bounds = array<i64: 1, 32, 128>}, {transform_indices = @transform_4, window_bounds = array<i64: 1, 8, 32>}]} {
    %c0_i32 = arith.constant 0 : i32
    %0 = arith.cmpi eq, %arg1, %c0_i32 : i32
    %1 = arith.extui %0 : i1 to i32
    %c0_i32_0 = arith.constant 0 : i32
    %2 = arith.cmpi ne, %1, %c0_i32_0 : i32
    scf.if %2 {
      %cst_25 = arith.constant 0.000000e+00 : f32
      %57 = vector.broadcast %cst_25 : f32 to vector<8x32xf32>
      %c0_26 = arith.constant 0 : index
      %c0_27 = arith.constant 0 : index
      %58 = vector.load %arg7[%c0_26, %c0_27] : memref<8x32xf32, #tpu.memory_space<vmem>>, vector<8x32xf32>
      tpu.vector_store %arg7[%c0_26, %c0_27], %57 {strides = array<i32>} : memref<8x32xf32, #tpu.memory_space<vmem>>, vector<8x32xf32>,
      %cst_28 = arith.constant 0.000000e+00 : f32
      %59 = vector.broadcast %cst_28 : f32 to vector<8x32xf32>
      %c0_29 = arith.constant 0 : index
      %c0_30 = arith.constant 0 : index
      %60 = vector.load %arg8[%c0_29, %c0_30] : memref<8x32xf32, #tpu.memory_space<vmem>>, vector<8x32xf32>
      tpu.vector_store %arg8[%c0_29, %c0_30], %59 {strides = array<i32>} : memref<8x32xf32, #tpu.memory_space<vmem>>, vector<8x32xf32>,
    } else {
    }
    %c0 = arith.constant 0 : index
    %c0_1 = arith.constant 0 : index
    %3 = vector.load %arg7[%c0, %c0_1] : memref<8x32xf32, #tpu.memory_space<vmem>>, vector<8x32xf32>
    %c0_2 = arith.constant 0 : index
    %c0_3 = arith.constant 0 : index
    %4 = vector.load %arg8[%c0_2, %c0_3] : memref<8x32xf32, #tpu.memory_space<vmem>>, vector<8x32xf32>
    %c0_4 = arith.constant 0 : index
    %c0_5 = arith.constant 0 : index
    %c0_6 = arith.constant 0 : index
    %c0_7 = arith.constant 0 : index
    %5 = vector.load %arg2[%c0_4, %c0_5, %c0_6, %c0_7] : memref<1x1x8x128xf32, #tpu.memory_space<vmem>>, vector<1x1x8x128xf32>
    %6 = vector.shape_cast %5 : vector<1x1x8x128xf32> to vector<8x128xf32>
    %c0_8 = arith.constant 0 : index
    %c0_9 = arith.constant 0 : index
    %c0_10 = arith.constant 0 : index
    %7 = vector.load %arg5[%c0_8, %c0_9, %c0_10] : memref<1x32x128xf32, #tpu.memory_space<vmem>>, vector<1x32x128xf32>
    %8 = vector.shape_cast %7 : vector<1x32x128xf32> to vector<32x128xf32>
    %cst = arith.constant dense<0.000000e+00> : vector<8x128xf32>
    %9 = tpu.matmul %3, %8, %cst {dimension_numbers = #tpu.dot_dimension_numbers<[1], [0], [0], [1], [0, 0, 1, 1], [], []>} : vector<8x32xf32>, vector<32x128xf32>, vector<8x128xf32> -> vector<8x128xf32>
    %10 = arith.addf %6, %9 : vector<8x128xf32>
    %11 = vector.extract_strided_slice %10 {offsets = [0, 0], sizes = [8, 32], strides = [1, 1]} : vector<8x128xf32> to vector<8x32xf32>
    %12 = arith.negf %11 : vector<8x32xf32>
    %13 = math.exp %12 : vector<8x32xf32>
    %cst_11 = arith.constant 1.000000e+00 : f32
    %14 = vector.broadcast %cst_11 : f32 to vector<8x32xf32>
    %15 = arith.addf %14, %13 : vector<8x32xf32>
    %16 = arith.divf %14, %15 : vector<8x32xf32>
    %17 = vector.extract_strided_slice %10 {offsets = [0, 32], sizes = [8, 32], strides = [1, 1]} : vector<8x128xf32> to vector<8x32xf32>
    %18 = arith.negf %17 : vector<8x32xf32>
    %19 = math.exp %18 : vector<8x32xf32>
    %cst_12 = arith.constant 1.000000e+00 : f32
    %20 = vector.broadcast %cst_12 : f32 to vector<8x32xf32>
    %21 = arith.addf %20, %19 : vector<8x32xf32>
    %22 = arith.divf %20, %21 : vector<8x32xf32>
    %23 = vector.extract_strided_slice %10 {offsets = [0, 64], sizes = [8, 32], strides = [1, 1]} : vector<8x128xf32> to vector<8x32xf32>
    %24 = math.tanh %23 : vector<8x32xf32>
    %25 = vector.extract_strided_slice %10 {offsets = [0, 96], sizes = [8, 32], strides = [1, 1]} : vector<8x128xf32> to vector<8x32xf32>
    %26 = arith.negf %25 : vector<8x32xf32>
    %27 = math.exp %26 : vector<8x32xf32>
    %cst_13 = arith.constant 1.000000e+00 : f32
    %28 = vector.broadcast %cst_13 : f32 to vector<8x32xf32>
    %29 = arith.addf %28, %27 : vector<8x32xf32>
    %30 = arith.divf %28, %29 : vector<8x32xf32>
    %31 = arith.mulf %22, %4 : vector<8x32xf32>
    %32 = arith.mulf %16, %24 : vector<8x32xf32>
    %33 = arith.addf %31, %32 : vector<8x32xf32>
    %34 = math.tanh %33 : vector<8x32xf32>
    %35 = arith.mulf %30, %34 : vector<8x32xf32>
    %36 = arith.sitofp %arg1 : i32 to f32
    %c0_14 = arith.constant 0 : index
    %c0_15 = arith.constant 0 : index
    %c0_16 = arith.constant 0 : index
    %37 = vector.load %arg3[%c0_14, %c0_15, %c0_16] : memref<1x8x1xf32, #tpu.memory_space<vmem>>, vector<1x8x1xf32>
    %38 = vector.shape_cast %37 : vector<1x8x1xf32> to vector<8x1xf32>
    %39 = vector.broadcast %36 : f32 to vector<8x1xf32>
    %40 = arith.cmpf oge, %39, %38 : vector<8x1xf32>
    %c0_17 = arith.constant 0 : index
    %c0_18 = arith.constant 0 : index
    %c0_19 = arith.constant 0 : index
    %41 = vector.load %arg4[%c0_17, %c0_18, %c0_19] : memref<1x8x1xf32, #tpu.memory_space<vmem>>, vector<1x8x1xf32>
    %42 = vector.shape_cast %41 : vector<1x8x1xf32> to vector<8x1xf32>
    %43 = vector.broadcast %36 : f32 to vector<8x1xf32>
    %44 = arith.cmpf olt, %43, %42 : vector<8x1xf32>
    %45 = arith.andi %40, %44 : vector<8x1xi1>
    %46 = vector.shape_cast %45 : vector<8x1xi1> to vector<8x1xi1>
    %47 = vector.broadcast %46 : vector<8x1xi1> to vector<8x32xi1>
    %48 = arith.select %47, %35, %3 : vector<8x32xi1>, vector<8x32xf32>
    %c0_20 = arith.constant 0 : index
    %c0_21 = arith.constant 0 : index
    %49 = vector.load %arg7[%c0_20, %c0_21] : memref<8x32xf32, #tpu.memory_space<vmem>>, vector<8x32xf32>
    tpu.vector_store %arg7[%c0_20, %c0_21], %48 {strides = array<i32>} : memref<8x32xf32, #tpu.memory_space<vmem>>, vector<8x32xf32>,
    %50 = vector.shape_cast %45 : vector<8x1xi1> to vector<8x1xi1>
    %51 = vector.broadcast %50 : vector<8x1xi1> to vector<8x32xi1>
    %52 = arith.select %51, %33, %4 : vector<8x32xi1>, vector<8x32xf32>
    %c0_22 = arith.constant 0 : index
    %c0_23 = arith.constant 0 : index
    %53 = vector.load %arg8[%c0_22, %c0_23] : memref<8x32xf32, #tpu.memory_space<vmem>>, vector<8x32xf32>
    tpu.vector_store %arg8[%c0_22, %c0_23], %52 {strides = array<i32>} : memref<8x32xf32, #tpu.memory_space<vmem>>, vector<8x32xf32>,
    %c7_i32 = arith.constant 7 : i32
    %54 = arith.cmpi eq, %arg1, %c7_i32 : i32
    %55 = arith.extui %54 : i1 to i32
    %c0_i32_24 = arith.constant 0 : i32
    %56 = arith.cmpi ne, %55, %c0_i32_24 : i32
    scf.if %56 {
      %c0_25 = arith.constant 0 : index
      %c0_26 = arith.constant 0 : index
      %57 = vector.load %arg7[%c0_25, %c0_26] : memref<8x32xf32, #tpu.memory_space<vmem>>, vector<8x32xf32>
      %c0_27 = arith.constant 0 : index
      %c0_28 = arith.constant 0 : index
      %c0_29 = arith.constant 0 : index
      %58 = vector.load %arg6[%c0_27, %c0_28, %c0_29] : memref<1x8x32xf32, #tpu.memory_space<vmem>>, vector<1x8x32xf32>
      %59 = vector.shape_cast %58 : vector<1x8x32xf32> to vector<8x32xf32>
      %60 = vector.shape_cast %57 : vector<8x32xf32> to vector<1x8x32xf32>
      tpu.vector_store %arg6[%c0_27, %c0_28, %c0_29], %60 {strides = array<i32>} : memref<1x8x32xf32, #tpu.memory_space<vmem>>, vector<1x8x32xf32>,
    } else {
    }
    return
  }
  func.func @transform_0(%arg0: i32, %arg1: i32) -> (i32, i32, i32, i32) {
    %c0_i32 = arith.constant 0 : i32
    %c0_i32_0 = arith.constant 0 : i32
    %c0_i32_1 = arith.constant 0 : i32
    return %arg0, %arg1, %c0_i32, %c0_i32_0 : i32, i32, i32, i32
  }
  func.func @transform_1(%arg0: i32, %arg1: i32) -> (i32, i32, i32) {
    %c0_i32 = arith.constant 0 : i32
    %c0_i32_0 = arith.constant 0 : i32
    %c0_i32_1 = arith.constant 0 : i32
    return %arg0, %c0_i32, %c0_i32_0 : i32, i32, i32
  }
  func.func @transform_2(%arg0: i32, %arg1: i32) -> (i32, i32, i32) {
    %c0_i32 = arith.constant 0 : i32
    %c0_i32_0 = arith.constant 0 : i32
    %c0_i32_1 = arith.constant 0 : i32
    return %arg0, %c0_i32, %c0_i32_0 : i32, i32, i32
  }
  func.func @transform_3(%arg0: i32, %arg1: i32) -> (i32, i32, i32) {
    %c0_i32 = arith.constant 0 : i32
    %c0_i32_0 = arith.constant 0 : i32
    %c0_i32_1 = arith.constant 0 : i32
    return %arg0, %c0_i32, %c0_i32_0 : i32, i32, i32
  }
  func.func @transform_4(%arg0: i32, %arg1: i32) -> (i32, i32, i32) {
    %c0_i32 = arith.constant 0 : i32
    %c0_i32_0 = arith.constant 0 : i32
    %c0_i32_1 = arith.constant 0 : i32
    return %arg0, %c0_i32, %c0_i32_0 : i32, i32, i32
  }
}

module attributes {stable_mosaic.version = 11 : i64} {
  func.func @_fuse_loss_kernel(%arg0: memref<2x96xf32, #tpu.memory_space<vmem>>, %arg1: memref<2x32xf32, #tpu.memory_space<vmem>>, %arg2: memref<2x32xf32, #tpu.memory_space<vmem>>, %arg3: memref<96x32xf32, #tpu.memory_space<vmem>>, %arg4: memref<1x32xf32, #tpu.memory_space<vmem>>, %arg5: memref<32x32xf32, #tpu.memory_space<vmem>>, %arg6: memref<1x32xf32, #tpu.memory_space<vmem>>, %arg7: memref<2x1xf32, #tpu.memory_space<vmem>>) attributes {dimension_semantics = [], scalar_prefetch = 0 : i64, scratch_operands = 0 : i64, tpu.core_type = #tpu.core_type<tc>} {
    %c0 = arith.constant 0 : index
    %c0_0 = arith.constant 0 : index
    %0 = vector.load %arg0[%c0, %c0_0] : memref<2x96xf32, #tpu.memory_space<vmem>>, vector<2x96xf32>
    %c0_1 = arith.constant 0 : index
    %c0_2 = arith.constant 0 : index
    %1 = vector.load %arg3[%c0_1, %c0_2] : memref<96x32xf32, #tpu.memory_space<vmem>>, vector<96x32xf32>
    %cst = arith.constant dense<0.000000e+00> : vector<2x32xf32>
    %2 = tpu.matmul %0, %1, %cst {dimension_numbers = #tpu.dot_dimension_numbers<[1], [0], [0], [1], [0, 0, 1, 1], [], []>} : vector<2x96xf32>, vector<96x32xf32>, vector<2x32xf32> -> vector<2x32xf32>
    %c0_3 = arith.constant 0 : index
    %c0_4 = arith.constant 0 : index
    %3 = vector.load %arg4[%c0_3, %c0_4] : memref<1x32xf32, #tpu.memory_space<vmem>>, vector<1x32xf32>
    %4 = vector.broadcast %3 : vector<1x32xf32> to vector<2x32xf32>
    %5 = arith.addf %2, %4 : vector<2x32xf32>
    %6 = math.tanh %5 : vector<2x32xf32>
    %c0_5 = arith.constant 0 : index
    %c0_6 = arith.constant 0 : index
    %7 = vector.load %arg5[%c0_5, %c0_6] : memref<32x32xf32, #tpu.memory_space<vmem>>, vector<32x32xf32>
    %cst_7 = arith.constant dense<0.000000e+00> : vector<2x32xf32>
    %8 = tpu.matmul %6, %7, %cst_7 {dimension_numbers = #tpu.dot_dimension_numbers<[1], [0], [0], [1], [0, 0, 1, 1], [], []>} : vector<2x32xf32>, vector<32x32xf32>, vector<2x32xf32> -> vector<2x32xf32>
    %c0_8 = arith.constant 0 : index
    %c0_9 = arith.constant 0 : index
    %9 = vector.load %arg6[%c0_8, %c0_9] : memref<1x32xf32, #tpu.memory_space<vmem>>, vector<1x32xf32>
    %10 = vector.broadcast %9 : vector<1x32xf32> to vector<2x32xf32>
    %11 = arith.addf %8, %10 : vector<2x32xf32>
    %c0_10 = arith.constant 0 : index
    %c0_11 = arith.constant 0 : index
    %12 = vector.load %arg1[%c0_10, %c0_11] : memref<2x32xf32, #tpu.memory_space<vmem>>, vector<2x32xf32>
    %13 = arith.mulf %11, %12 : vector<2x32xf32>
    %cst_12 = arith.constant dense<0.000000e+00> : vector<2xf32>
    %14 = vector.multi_reduction <add>, %13, %cst_12 [1] : vector<2x32xf32> to vector<2xf32>
    %15 = vector.shape_cast %14 : vector<2xf32> to vector<2x1xf32>
    %16 = arith.mulf %11, %11 : vector<2x32xf32>
    %cst_13 = arith.constant dense<0.000000e+00> : vector<2xf32>
    %17 = vector.multi_reduction <add>, %16, %cst_13 [1] : vector<2x32xf32> to vector<2xf32>
    %18 = vector.shape_cast %17 : vector<2xf32> to vector<2x1xf32>
    %19 = arith.mulf %12, %12 : vector<2x32xf32>
    %cst_14 = arith.constant dense<0.000000e+00> : vector<2xf32>
    %20 = vector.multi_reduction <add>, %19, %cst_14 [1] : vector<2x32xf32> to vector<2xf32>
    %21 = vector.shape_cast %20 : vector<2xf32> to vector<2x1xf32>
    %22 = arith.mulf %18, %21 : vector<2x1xf32>
    %cst_15 = arith.constant 1.000000e-16 : f32
    %23 = vector.broadcast %cst_15 : f32 to vector<2x1xf32>
    %24 = arith.maximumf %22, %23 : vector<2x1xf32>
    %25 = math.rsqrt %24 : vector<2x1xf32>
    %26 = arith.mulf %15, %25 : vector<2x1xf32>
    %c0_16 = arith.constant 0 : index
    %c0_17 = arith.constant 0 : index
    %27 = vector.load %arg2[%c0_16, %c0_17] : memref<2x32xf32, #tpu.memory_space<vmem>>, vector<2x32xf32>
    %28 = arith.mulf %11, %27 : vector<2x32xf32>
    %cst_18 = arith.constant dense<0.000000e+00> : vector<2xf32>
    %29 = vector.multi_reduction <add>, %28, %cst_18 [1] : vector<2x32xf32> to vector<2xf32>
    %30 = vector.shape_cast %29 : vector<2xf32> to vector<2x1xf32>
    %31 = arith.mulf %11, %11 : vector<2x32xf32>
    %cst_19 = arith.constant dense<0.000000e+00> : vector<2xf32>
    %32 = vector.multi_reduction <add>, %31, %cst_19 [1] : vector<2x32xf32> to vector<2xf32>
    %33 = vector.shape_cast %32 : vector<2xf32> to vector<2x1xf32>
    %34 = arith.mulf %27, %27 : vector<2x32xf32>
    %cst_20 = arith.constant dense<0.000000e+00> : vector<2xf32>
    %35 = vector.multi_reduction <add>, %34, %cst_20 [1] : vector<2x32xf32> to vector<2xf32>
    %36 = vector.shape_cast %35 : vector<2xf32> to vector<2x1xf32>
    %37 = arith.mulf %33, %36 : vector<2x1xf32>
    %cst_21 = arith.constant 1.000000e-16 : f32
    %38 = vector.broadcast %cst_21 : f32 to vector<2x1xf32>
    %39 = arith.maximumf %37, %38 : vector<2x1xf32>
    %40 = math.rsqrt %39 : vector<2x1xf32>
    %41 = arith.mulf %30, %40 : vector<2x1xf32>
    %cst_22 = arith.constant 6.000000e-01 : f32
    %42 = vector.broadcast %cst_22 : f32 to vector<2x1xf32>
    %43 = arith.subf %42, %26 : vector<2x1xf32>
    %44 = arith.addf %43, %41 : vector<2x1xf32>
    %cst_23 = arith.constant 9.99999997E-7 : f32
    %45 = vector.broadcast %cst_23 : f32 to vector<2x1xf32>
    %46 = arith.maximumf %44, %45 : vector<2x1xf32>
    %c0_24 = arith.constant 0 : index
    %c0_25 = arith.constant 0 : index
    %47 = vector.load %arg7[%c0_24, %c0_25] : memref<2x1xf32, #tpu.memory_space<vmem>>, vector<2x1xf32>
    tpu.vector_store %arg7[%c0_24, %c0_25], %46 {strides = array<i32>} : memref<2x1xf32, #tpu.memory_space<vmem>>, vector<2x1xf32>,
    return
  }
}

</mosaic_0001>

<bundles_post_ra>
// kernel: joint_embeder_forward.3
= control target key start
LH: loop header
LB: loop body
LE: loop exit
PB: predicated region body
PF: predicated region fallthrough
CT: control target
= control target key end

     0   :  { %s696_s15 = smov 0   ;;  %s698_s16 = smov 0   ;;  %s788_s0 = inlined_call_operand.vmem [shape: f32[4,8,8,64], index: 0, kind: input, shape index: {}]   ;;  %s789_s1 = inlined_call_operand.vmem [shape: f32[4,8,1], index: 1, kind: input, shape index: {}]   ;;  %s790_s2 = inlined_call_operand.vmem [shape: f32[4,8,1], index: 2, kind: input, shape index: {}]   ;;  %s791_s3 = inlined_call_operand.vmem [shape: f32[4,16,64], index: 3, kind: input, shape index: {}]   ;;  %s792_s4 = inlined_call_operand.vmem [shape: f32[4,8,16], index: 4, kind: output, shape index: {}]  }
   0x1   :  { %s700_s17 = smov 0   ;;  %s702_s18 = smov 0  }
   0x2   :  { %s704_s19 = smov 0  }
   0x3 LB: > { %s23_s20 = sadd.s32 1, %s650_s17  ;;  %s26_s21 = sadd.s32 1, %s654_s18  ;;  %s658_s19 = sphi %s704_s19, %s14_s19   ;;  %s654_s18 = sphi %s702_s18, %s796_s18   ;;  %s650_s17 = sphi %s700_s17, %s795_s17   ;;  %s646_s16 = sphi %s698_s16, %s794_s16   ;;  %s642_s15 = sphi %s696_s15, %s793_s15  }
   0x4   : > { %p24_p0 = scmp.ge.s32.totalorder %s23_s20, 8  ;;  %p531_p1 = scmp.ge.s32.totalorder %s658_s19, 1 }
   0x5   : > { %p207_p2 = scmp.lt.s32.totalorder %s658_s19, 33 }
   0x6   : > { %s798_s20 = smov (%p24_p0, %s23_s20), 0  ;;  %s800_s21 = smov (!%p24_p0, %s26_s21), %s654_s18 }
   0x7   : > { %p208_p3 = pnand %p531_p1, %p207_p2  ;;  %p28_p4 = scmp.ge.s32.totalorder %s800_s21, 4 }
   0x8   : > { %p248_p5 = scmp.lt.s32.totalorder (!%p208_p3), %s646_s16, 3  ;;  %p250_p6 = scmp.lt.s32.totalorder (!%p208_p3), %s642_s15, 7 }
   0x9   : > { %s802_s21 = smov (%p28_p4, %s800_s21), 0  ;;  %211 = sbr.rel (%p208_p3) target bundleno = 741 (0x2e5), region = 36 }
   0xa   : > { %p539_p7 = scmp.ne.s32.totalorder (!%p208_p3), %s642_s15, 0 }
  0x10   : > { %s804_s16 = smov (!%p248_p5, %s646_s16), 3  ;;  %276 = sbr.rel (%p539_p7) target bundleno = 23 (0x17), region = 40 }
  0x11   : > { %s251_s22 = scalar_select %p250_p6, %s642_s15, 7 }
  0x12   : > { %s730_s23 = sshll.u32 %s804_s16, 3  ;;  %s545_s24 = sshll.u32 %s804_s16, 4  ;;  %vm277_vm0 = vcmask (!%p539_p7), 130048   ;;  %v660_v0 = vmov (!%p539_p7), 0.0  }
  0x13   : > { %s253_s25 = sadd.s32 %s730_s23, %s251_s22  ;;  %s259_s28 = scalar_lea.vmem %s789_s1, %s730_s23  ;;  %278 = vst.msk [vmem:[#allocation2] sm:$0xff] (!%p539_p7), %vm277_vm0, %v660_v0  ;;  %279 = vst.msk [vmem:[#allocation3] sm:$0xff] (!%p539_p7), %vm277_vm0, %v660_v0 }
  0x14   : > { %s533_s29 = sshll.u32 %s253_s25, 3  ;;  %s263_s6 = scalar_lea.vmem %s790_s2, %s730_s23 }
  0x15   : > { %s255_s9 = scalar_lea.vmem %s788_s0, %s533_s29  ;;  %s268_s12 = scalar_lea.vmem %s791_s3, %s545_s24 }
  0x16   : > { %s272_s16 = scalar_lea.vmem %s792_s4, %s730_s23 }
  0x17 PF: > { %v283_v1 = vld [vmem:[%s268_s12] sm:$0xff]  ;;  %v284_v2 = vld [vmem:[%s268_s12 + $0x8] sm:$0xff]  ;;  %v661_v3 = vmov 0.0|0.0   ;;  %vm662_vm1 = vmmov 0   ;;  %v663_v5 = vmov 0.0   ;;  %vm285_vm2 = vcmask 130048   ;;  %s388_s25 = scvt.s32.f32 %s642_s15 }
  0x18   : > { %556 = vmatprep.subr.bf16.mxu0 %v661_v3  ;;  %v557_v4 = vpack.c.bf16 %v284_v2, %v283_v1  ;;  %553 = vmatprep.mubr.msk.f32.mxu0 %vm662_vm1, %v663_v5  ;;  %v282_v7 = vld [vmem:[%s255_s9] sm:$0xff]  ;;  %v664_v11 = vmov 0   ;;  %s665_s22 = smov 96   ;;  %s666_s24 = smov 16  }
  0x19   : > { %610 = vset.pattern.permute.xlu1 %v664_v11  ;;  %611 = vset.pattern.permute.xlu0 %v664_v11  ;;  %v389_v17 = vld [vmem:[%s259_s28] sm:$0xff]  ;;  %v390_v18 = vstv %s388_s25  ;;  %s667_s5 = smov 48   ;;  %s668_s28 = smov 32  }
  0x1a   : > { %558 = vmatpush3.bf16.msra.mxu0 %v557_v4  ;;  %v280_v6 = vld [vmem:[#allocation2] sm:$0xff]  ;;  %v281_v13 = vld [vmem:[#allocation3] sm:$0xff]  ;;  %vm391_vm3 = vcmp.ge.f32.partialorder %v390_v18, %v389_v17  ;;  %s670_s7 = smov 80   ;;  %p542_p8 = scmp.ne.s32.totalorder %s642_s15, 7 }
  0x1b   : > { %v392_v19 = vld [vmem:[%s263_s6] sm:$0xff]  ;;  %s669_s6 = smov 112  }
  0x1c   : > { %vm393_vm4 = vcmp.lt.f32.partialorder %v390_v18, %v392_v19 }
  0x1d   : > { %554 = vmatmul.mubr.msk.f32.vlgmr.msra.gmra.mrb[0].mxu0 %vm285_vm2, %v280_v6  ;;  %vm394_vm5 = vmand %vm391_vm3, %vm393_vm4 }
  0x1e   : > { %v395_v23 = vsel %vm394_vm5, 1, %v664_v11 }
  0xf0   : > { %v355_v8 = vpop.f32.mrb[0].mxu0 }
  0xf1   : > { %v359_v9 = vadd.f32 %v355_v8, %v282_v7  ;;  %v555_v10 = vpop.f32.mrb[1].mxu0 }
  0xf3   : > { %612 = vtanh.f32 %v359_v9  ;;  %v541_v14 = vmul.f32 -1.442695, %v359_v9 }
  0xf5   : > { %614 = vpow2.f32 %v541_v14 }
  0xfd   : > { %v613_v12 = vpop.eup %612 }
  0xfe   : > { %373 = vrot.lane.b32.xlu0 %v613_v12, %s665_s22 }
  0xff   : > { %v615_v15 = vpop.eup %614 }
 0x100   : > { %v363_v16 = vadd.f32 1.0, %v615_v15 }
 0x102   : > { %368 = vrot.lane.b32.xlu0 %v281_v13, %s666_s24  ;;  %616 = vrcp.f32 %v363_v16 }
 0x10c   : > { %v617_v20 = vpop.eup %616 }
 0x170   : > { %v374_v21 = vpop.permute.xlu0 %373 }
 0x171   : > { %v376_v22 = vmul.f32 %v617_v20, %v374_v21 }
 0x173   : > { %378 = vrot.lane.b32.xlu1 %v376_v22, %s666_s24 }
 0x174   : > { %v369_v24 = vpop.permute.xlu0 %368 }
 0x175   : > { %v371_v25 = vmul.f32 %v617_v20, %v369_v24 }
 0x177   : > { %397 = vperm.xlu1 %610, %v395_v23  }
 0x17b   : > { %400 = vrot.lane.b32.xlu1 %v280_v6, %s667_s5 }
 0x1e5   : > { %v379_v26 = vpop.permute.xlu1 %378 }
 0x1e6   : > { %v381_v27 = vadd.f32 %v379_v26, %v371_v25 }
 0x1e8   : > { %618 = vtanh.f32 %v381_v27 }
 0x1f2   : > { %v619_v28 = vpop.eup %618 }
 0x1f3   : > { %384 = vrot.lane.b32.xlu0 %v619_v28, %s668_s28 }
 0x1f6   : > { %v398_v29 = vpop.permute.xlu1 %397 }
 0x1f7   : > { %vm399_vm6 = vcmp.eq.s32.totalorder %v398_v29, 1 }
 0x1f8   : > { %v409_v30 = vsel %vm399_vm6, %v381_v27, %v369_v24 }
 0x1f9   : > { %411 = vrot.lane.b32.xlu1 %v409_v30, %s669_s6 }
 0x1fa   : > { %v401_v32 = vpop.permute.xlu1 %400 }
 0x265   : > { %v385_v31 = vpop.permute.xlu0 %384 }
 0x266   : > { %v387_v33 = vmul.f32 %v617_v20, %v385_v31 }
 0x268   : > { %v403_v34 = vsel %vm399_vm6, %v387_v33, %v401_v32 }
 0x269   : > { %405 = vrot.lane.b32.xlu0 %v403_v34, %s670_s7 }
 0x26b   : > { %v412_v35 = vpop.permute.xlu1 %411 }
 0x26c   : > { %414 = vst.msk [vmem:[#allocation3] sm:$0xff] %vm285_vm2, %v412_v35 }
 0x2d6   : > { %418 = sbr.rel (%p542_p8) target bundleno = 741 (0x2e5), region = 44 }
 0x2db   : > { %v406_v36 = vpop.permute.xlu0 %405 }
 0x2dc   : > { %408 = vst.msk [vmem:[#allocation2] sm:$0xff] %vm285_vm2, %v406_v36 }
 0x2e3   : > { %v419_v37 = vld [vmem:[#allocation2] sm:$0xff] }
 0x2e4   : > { %420 = vst.msk [vmem:[%s272_s16] sm:$0xff] %vm285_vm2, %v419_v37 }
 0x2e5 PF: > { %s14_s19 = sadd.s32 1, %s658_s19   ;;  %s793_s15 = smov %s650_s17 }
 0x2e6   : > { %p11_p9 = scmp.ge.s32.totalorder %s14_s19, 34   ;;  %s794_s16 = smov %s654_s18 }
 0x2e7   : > { %s795_s17 = smov %s798_s20  ;;  %s796_s18 = smov %s802_s21 }
 0x2e8   :  { %13 = sbr.rel (!%p11_p9) target bundleno = 3 (0x3), region = 83 }

// kernel: joint_embeder_forward.4
= control target key start
LH: loop header
LB: loop body
LE: loop exit
PB: predicated region body
PF: predicated region fallthrough
CT: control target
= control target key end

     0   :  { %s669_s15 = smov 0   ;;  %s671_s16 = smov 0   ;;  %s736_s0 = inlined_call_operand.vmem [shape: f32[1,8,8,128], index: 0, kind: input, shape index: {}]   ;;  %s737_s1 = inlined_call_operand.vmem [shape: f32[1,8,1], index: 1, kind: input, shape index: {}]   ;;  %s738_s2 = inlined_call_operand.vmem [shape: f32[1,8,1], index: 2, kind: input, shape index: {}]   ;;  %s739_s3 = inlined_call_operand.vmem [shape: f32[1,32,128], index: 3, kind: input, shape index: {}]   ;;  %s740_s4 = inlined_call_operand.vmem [shape: f32[1,8,32], index: 4, kind: output, shape index: {}]  }
   0x1   :  { %s673_s17 = smov 0  }
   0x2 LB: > { %s23_s18 = sadd.s32 1, %s630_s16  ;;  %p539_p0 = scmp.ge.s32.totalorder %s634_s17, 1  ;;  %s634_s17 = sphi %s673_s17, %s14_s17   ;;  %s630_s16 = sphi %s671_s16, %s742_s16   ;;  %s626_s15 = sphi %s669_s15, %s741_s15  }
   0x3   : > { %p24_p1 = scmp.ge.s32.totalorder %s23_s18, 8  ;;  %p207_p2 = scmp.lt.s32.totalorder %s634_s17, 9 }
   0x5   : > { %s744_s18 = smov (%p24_p1, %s23_s18), 0  ;;  %p208_p3 = pnand %p539_p0, %p207_p2 }
   0x6   : > { %p250_p4 = scmp.lt.s32.totalorder (!%p208_p3), %s626_s15, 7  ;;  %p541_p5 = scmp.ne.s32.totalorder (!%p208_p3), %s626_s15, 0 }
   0x7   : > { %211 = sbr.rel (%p208_p3) target bundleno = 744 (0x2e8), region = 36 }
   0xe   : > { %s251_s19 = scalar_select %p250_p4, %s626_s15, 7 }
   0xf   : > { %276 = sbr.rel (%p541_p5) target bundleno = 22 (0x16), region = 40  ;;  %vm277_vm0 = vcmask (!%p541_p5), 261120   ;;  %v636_v0 = vmov (!%p541_p5), 0.0  }
  0x10   : > { %s540_s20 = sshll.u32 %s251_s19, 3  ;;  %278 = vst.msk [vmem:[#allocation2] sm:$0xff] (!%p541_p5), %vm277_vm0, %v636_v0  ;;  %279 = vst.msk [vmem:[#allocation3] sm:$0xff] (!%p541_p5), %vm277_vm0, %v636_v0 }
  0x11   : > { %s255_s23 = scalar_lea.vmem %s736_s0, %s540_s20 }
  0x16 PF: > { %v283_v1 = vld [vmem:[%s739_s3] sm:$0xff]  ;;  %v284_v2 = vld [vmem:[%s739_s3 + $0x8] sm:$0xff]  ;;  %v285_v3 = vld [vmem:[%s739_s3 + $0x10] sm:$0xff]  ;;  %v637_v4 = vmov 0.0|0.0   ;;  %vm638_vm1 = vmmov 0   ;;  %v639_v7 = vmov 0.0   ;;  %s390_s8 = scvt.s32.f32 %s626_s15 }
  0x17   : > { %564 = vmatprep.subr.bf16.mxu0 %v637_v4  ;;  %v565_v5 = vpack.c.bf16 %v284_v2, %v283_v1  ;;  %v286_v6 = vld [vmem:[%s739_s3 + $0x18] sm:$0xff]  ;;  %561 = vmatprep.mubr.msk.f32.mxu0 %vm638_vm1, %v639_v7  ;;  %v280_v9 = vld [vmem:[#allocation2] sm:$0xff]  ;;  %vm287_vm2 = vcmask 261120   ;;  %v640_v14 = vmov 0   ;;  %s641_s6 = smov 64   ;;  %v281_v16 = vld [vmem:[#allocation3] sm:$0xff] }
  0x18   : > { %v568_v8 = vpack.c.bf16 %v286_v6, %v285_v3  ;;  %v282_v10 = vld [vmem:[%s255_s23] sm:$0xff]  ;;  %602 = vset.pattern.permute.xlu1 %v640_v14  ;;  %603 = vset.pattern.permute.xlu0 %v640_v14  ;;  %s642_s7 = smov 32   ;;  %v392_v21 = vstv %s390_s8  ;;  %s643_s13 = smov 96  }
  0x19   : > { %566 = vmatpush3.bf16.msra.mxu0 %v565_v5  ;;  %v391_v20 = vld [vmem:[%s737_s1] sm:$0xff]  ;;  %p544_p6 = scmp.ne.s32.totalorder %s626_s15, 7 }
  0x1a   : > { %567 = vmatprep.subr.bf16.mxu0 %v637_v4  ;;  %v394_v22 = vld [vmem:[%s738_s2] sm:$0xff]  ;;  %vm393_vm3 = vcmp.ge.f32.partialorder %v392_v21, %v391_v20 }
  0x1b   : > { %vm395_vm4 = vcmp.lt.f32.partialorder %v392_v21, %v394_v22 }
  0x1c   : > { %vm396_vm5 = vmand %vm393_vm3, %vm395_vm4 }
  0x1d   : > { %569 = vmatpush3.bf16.msra.mxu0 %v568_v8  ;;  %v397_v26 = vsel %vm396_vm5, 1, %v640_v14 }
  0x20   : > { %562 = vmatmul.mubr.msk.f32.vlgmr.msra.gmra.mrb[0].mxu0 %vm287_vm2, %v280_v9 }
  0xf3   : > { %v357_v11 = vpop.f32.mrb[0].mxu0 }
  0xf4   : > { %v361_v12 = vadd.f32 %v357_v11, %v282_v10  ;;  %v563_v13 = vpop.f32.mrb[1].mxu0 }
  0xf6   : > { %604 = vtanh.f32 %v361_v12  ;;  %v543_v17 = vmul.f32 -1.442695, %v361_v12 }
  0xf8   : > { %606 = vpow2.f32 %v543_v17 }
 0x100   : > { %v605_v15 = vpop.eup %604 }
 0x101   : > { %375 = vrot.lane.b32.xlu0 %v605_v15, %s641_s6 }
 0x102   : > { %v607_v18 = vpop.eup %606 }
 0x103   : > { %v365_v19 = vadd.f32 1.0, %v607_v18 }
 0x105   : > { %370 = vrot.lane.b32.xlu0 %v281_v16, %s642_s7  ;;  %608 = vrcp.f32 %v365_v19 }
 0x10f   : > { %v609_v23 = vpop.eup %608 }
 0x173   : > { %v376_v24 = vpop.permute.xlu0 %375 }
 0x174   : > { %v378_v25 = vmul.f32 %v609_v23, %v376_v24 }
 0x176   : > { %380 = vrot.lane.b32.xlu1 %v378_v25, %s642_s7 }
 0x177   : > { %v371_v27 = vpop.permute.xlu0 %370 }
 0x178   : > { %v373_v28 = vmul.f32 %v609_v23, %v371_v27 }
 0x17a   : > { %399 = vperm.xlu1 %602, %v397_v26  }
 0x17e   : > { %402 = vrot.lane.b32.xlu1 %v280_v9, %s643_s13 }
 0x1e8   : > { %v381_v29 = vpop.permute.xlu1 %380 }
 0x1e9   : > { %v383_v30 = vadd.f32 %v381_v29, %v373_v28 }
 0x1eb   : > { %610 = vtanh.f32 %v383_v30 }
 0x1f5   : > { %v611_v31 = vpop.eup %610 }
 0x1f6   : > { %386 = vrot.lane.b32.xlu0 %v611_v31, %s641_s6 }
 0x1f9   : > { %v400_v32 = vpop.permute.xlu1 %399 }
 0x1fa   : > { %vm401_vm6 = vcmp.eq.s32.totalorder %v400_v32, 1 }
 0x1fb   : > { %v411_v33 = vsel %vm401_vm6, %v383_v30, %v371_v27 }
 0x1fc   : > { %413 = vrot.lane.b32.xlu1 %v411_v33, %s643_s13 }
 0x1fd   : > { %v403_v35 = vpop.permute.xlu1 %402 }
 0x268   : > { %v387_v34 = vpop.permute.xlu0 %386 }
 0x269   : > { %v389_v36 = vmul.f32 %v609_v23, %v387_v34 }
 0x26b   : > { %v405_v37 = vsel %vm401_vm6, %v389_v36, %v403_v35 }
 0x26c   : > { %407 = vrot.lane.b32.xlu0 %v405_v37, %s642_s7 }
 0x26e   : > { %v414_v38 = vpop.permute.xlu1 %413 }
 0x26f   : > { %416 = vst.msk [vmem:[#allocation3] sm:$0xff] %vm287_vm2, %v414_v38 }
 0x2d9   : > { %420 = sbr.rel (%p544_p6) target bundleno = 744 (0x2e8), region = 44 }
 0x2de   : > { %v408_v39 = vpop.permute.xlu0 %407 }
 0x2df   : > { %410 = vst.msk [vmem:[#allocation2] sm:$0xff] %vm287_vm2, %v408_v39 }
 0x2e6   : > { %v421_v40 = vld [vmem:[#allocation2] sm:$0xff] }
 0x2e7   : > { %422 = vst.msk [vmem:[%s740_s4] sm:$0xff] %vm287_vm2, %v421_v40 }
 0x2e8 PF: > { %s14_s17 = sadd.s32 1, %s634_s17   ;;  %s741_s15 = smov %s630_s16 }
 0x2e9   : > { %p11_p7 = scmp.ge.s32.totalorder %s14_s17, 10   ;;  %s742_s16 = smov %s744_s18 }
 0x2eb   :  { %13 = sbr.rel (!%p11_p7) target bundleno = 2 (0x2), region = 83 }

// kernel: joint_embeder_forward.5
= control target key start
LH: loop header
LB: loop body
LE: loop exit
PB: predicated region body
PF: predicated region fallthrough
CT: control target
= control target key end

     0   :  { %v339_v0 = vmov 0.0|0.0   ;;  %vm340_vm0 = vmmov 0   ;;  %v341_v4 = vmov 0.0   ;;  %vm46_vm1 = vcmask 785408   ;;  %s453_s3 = inlined_call_operand.vmem [shape: f32[96,32], index: 3, kind: input, shape index: {}]   ;;  %s454_s0 = inlined_call_operand.vmem [shape: f32[2,96], index: 0, kind: input, shape index: {}]   ;;  %s455_s5 = inlined_call_operand.vmem [shape: f32[32,32], index: 5, kind: input, shape index: {}]   ;;  %s456_s4 = inlined_call_operand.vmem [shape: f32[1,32], index: 4, kind: input, shape index: {}, may-alias: {4,6}]   ;;  %s457_s2 = inlined_call_operand.vmem [shape: f32[2,32], index: 2, kind: input, shape index: {}]   ;;  %s458_s6 = inlined_call_operand.vmem [shape: f32[1,32], index: 6, kind: input, shape index: {}, may-alias: {4,6}]   ;;  %s459_s1 = inlined_call_operand.vmem [shape: f32[2,32], index: 1, kind: input, shape index: {}]   ;;  %s460_s7 = inlined_call_operand.vmem [shape: f32[2,1], index: 7, kind: output, shape index: {}]  }
   0x1   :  { %306 = vmatprep.subr.bf16.mxu0 %v339_v0  ;;  %v27_v1 = vld [vmem:[%s453_s3] sm:$0xff]  ;;  %v28_v2 = vld [vmem:[%s453_s3 + $0x8] sm:$0xff]  ;;  %v29_v3 = vld [vmem:[%s453_s3 + $0x10] sm:$0xff]  ;;  %292 = vmatprep.mubr.msk.f32.mxu0 %vm340_vm0, %v341_v4  ;;  %vm132_vm2 = vcmask 261120   ;;  %vm208_vm3 = vcmask 254976   ;;  %vm240_vm4 = vcmask 1024  }
   0x2   :  { %v307_v5 = vpack.c.bf16 %v28_v2, %v27_v1  ;;  %v30_v6 = vld [vmem:[%s453_s3 + $0x18] sm:$0xff]  ;;  %324 = vmatprep.subr.bf16.mxu1 %v339_v0  ;;  %303 = vmatprep.mubr.msk.f32.mxu1 %vm340_vm0, %v341_v4  ;;  %v31_v8 = vld [vmem:[%s453_s3 + $0x20] sm:$0xff]  ;;  %v32_v9 = vld [vmem:[%s453_s3 + $0x28] sm:$0xff] }
   0x3   :  { %v310_v7 = vpack.c.bf16 %v30_v6, %v29_v3  ;;  %v313_v10 = vpack.c.bf16 %v32_v9, %v31_v8  ;;  %v33_v11 = vld [vmem:[%s453_s3 + $0x30] sm:$0xff]  ;;  %v34_v12 = vld [vmem:[%s453_s3 + $0x38] sm:$0xff]  ;;  %v35_v14 = vld [vmem:[%s453_s3 + $0x40] sm:$0xff] }
   0x4   :  { %308 = vmatpush3.bf16.msra.mxu0 %v307_v5  ;;  %v316_v13 = vpack.c.bf16 %v34_v12, %v33_v11  ;;  %v36_v15 = vld [vmem:[%s453_s3 + $0x48] sm:$0xff]  ;;  %v37_v17 = vld [vmem:[%s453_s3 + $0x50] sm:$0xff]  ;;  %v38_v18 = vld [vmem:[%s453_s3 + $0x58] sm:$0xff] }
   0x5   :  { %309 = vmatprep.subr.bf16.mxu0 %v339_v0  ;;  %v319_v16 = vpack.c.bf16 %v36_v15, %v35_v14  ;;  %v322_v19 = vpack.c.bf16 %v38_v18, %v37_v17  ;;  %v26_v20 = vld [vmem:[%s454_s0] sm:$0x3]  ;;  %v122_v22 = vld [vmem:[%s455_s5 + $0x8] sm:$0xff]  ;;  %v123_v23 = vld [vmem:[%s455_s5 + $0x10] sm:$0xff] }
   0x6   :  { %v121_v21 = vld [vmem:[%s455_s5] sm:$0xff]  ;;  %v124_v25 = vld [vmem:[%s455_s5 + $0x18] sm:$0xff] }
   0x7   :  { %v325_v24 = vpack.c.bf16 %v122_v22, %v121_v21  ;;  %v328_v26 = vpack.c.bf16 %v124_v25, %v123_v23  ;;  %v246_v27 = vld [vmem:[%s456_s4] ss:$0 sm:$0xff] }
   0x8   :  { %311 = vmatpush3.bf16.msra.mxu0 %v310_v7  ;;  %v224_v32 = vld [vmem:[%s457_s2] sm:$0x3] }
   0x9   :  { %312 = vmatprep.subr.bf16.mxu0 %v339_v0  ;;  %326 = vmatpush3.bf16.msra.mxu1 %v325_v24  ;;  %v229_v33 = vmul.f32 %v224_v32, %v224_v32  ;;  %v248_v35 = vld [vmem:[%s458_s6] ss:$0 sm:$0xff] }
   0xa   :  { %327 = vmatprep.subr.bf16.mxu1 %v339_v0  ;;  %v206_v37 = vld [vmem:[%s459_s1] sm:$0x3] }
   0xb   :  { %v230_v34 = vsel %vm208_vm3, %v229_v33, 0.0  ;;  %v216_v42 = vmul.f32 %v206_v37, %v206_v37 }
   0xc   :  { %314 = vmatpush3.bf16.msra.mxu0 %v313_v10  ;;  %231 = vadd.xlane.f32.xlu1 %v230_v34 }
   0xd   :  { %315 = vmatprep.subr.bf16.mxu0 %v339_v0  ;;  %329 = vmatpush3.bf16.msra.mxu1 %v328_v26  ;;  %v217_v45 = vsel %vm208_vm3, %v216_v42, 0.0 }
  0x10   :  { %317 = vmatpush3.bf16.msra.mxu0 %v316_v13 }
  0x11   :  { %318 = vmatprep.subr.bf16.mxu0 %v339_v0 }
  0x14   :  { %320 = vmatpush3.bf16.msra.mxu0 %v319_v16 }
  0x15   :  { %321 = vmatprep.subr.bf16.mxu0 %v339_v0 }
  0x18   :  { %323 = vmatpush3.bf16.msra.mxu0 %v322_v19 }
  0x1b   :  { %293 = vmatmul.mubr.msk.f32.vlgmr.msra.gmra.mrb[0].mxu0 %vm46_vm1, %v26_v20 }
  0x99   :  { %v232_v48 = vpop.xlane.xlu1 %231 }
  0xee   :  { %v116_v28 = vpop.f32.mrb[0].mxu0 }
  0xef   :  { %v117_v29 = vadd.f32 %v246_v27, %v116_v28  ;;  %v294_v30 = vpop.f32.mrb[1].mxu0 }
  0xf1   :  { %333 = vtanh.f32 %v117_v29 }
  0xfb   :  { %v334_v31 = vpop.eup %333 }
  0xfc   :  { %304 = vmatmul.mubr.msk.f32.vlgmr.msra.gmra.mrb[0].mxu1 %vm132_vm2, %v334_v31 }
 0x1cf   :  { %v202_v36 = vpop.f32.mrb[0].mxu1 }
 0x1d0   :  { %v203_v38 = vadd.f32 %v248_v35, %v202_v36  ;;  %v305_v39 = vpop.f32.mrb[1].mxu1 }
 0x1d2   :  { %v212_v40 = vmul.f32 %v203_v38, %v203_v38  ;;  %v207_v41 = vmul.f32 %v206_v37, %v203_v38  ;;  %v225_v46 = vmul.f32 %v224_v32, %v203_v38 }
 0x1d4   :  { %v213_v43 = vsel %vm208_vm3, %v212_v40, 0.0  ;;  %v209_v44 = vsel %vm208_vm3, %v207_v41, 0.0  ;;  %v226_v47 = vsel %vm208_vm3, %v225_v46, 0.0 }
 0x1d5   :  { %214 = vadd.xlane.f32.xlu0 %v213_v43  ;;  %210 = vadd.xlane.f32.xlu1 %v209_v44 }
 0x1d9   :  { %218 = vadd.xlane.f32.xlu0 %v217_v45 }
 0x1dd   :  { %227 = vadd.xlane.f32.xlu0 %v226_v47 }
 0x262   :  { %v215_v49 = vpop.xlane.xlu0 %214  ;;  %v211_v57 = vpop.xlane.xlu1 %210 }
 0x263   :  { %v233_v50 = vmul.f32 %v232_v48, %v215_v49 }
 0x265   :  { %v234_v51 = vmax.f32 %v233_v50, 1e-16 }
 0x266   :  { %v219_v52 = vpop.xlane.xlu0 %218 }
 0x267   :  { %v220_v53 = vmul.f32 %v219_v52, %v215_v49  ;;  %335 = vrsqrt.f32 %v234_v51 }
 0x269   :  { %v221_v54 = vmax.f32 %v220_v53, 1e-16 }
 0x26a   :  { %v228_v59 = vpop.xlane.xlu0 %227 }
 0x26b   :  { %337 = vrsqrt.f32 %v221_v54 }
 0x271   :  { %v336_v55 = vpop.eup %335 }
 0x272   :  { %v236_v60 = vmul.f32 %v336_v55, %v228_v59 }
 0x275   :  { %v338_v56 = vpop.eup %337 }
 0x276   :  { %v223_v58 = vmul.f32 %v338_v56, %v211_v57 }
 0x278   :  { %v237_v61 = vsub.f32 0.6, %v223_v58 }
 0x27a   :  { %v238_v62 = vadd.f32 %v237_v61, %v236_v60 }
 0x27c   :  { %v239_v63 = vmax.f32 %v238_v62, 1e-06 }
 0x27e   :  { %241 = vst.msk [vmem:[%s460_s7] sm:$0x3] %vm240_vm4, %v239_v63 }

</bundles_post_ra>
